<compile_context>
chip_gen: v5e
topology: v5e:2x2
jax: 0.10.0
libtpu: 0.0.40
codegen_flags: <defaults>
</compile_context>

<pallas_src>
import jax
import jax.numpy as jnp
from jax import lax
from jax.experimental import pallas as pl
from jax.experimental.pallas import tpu as pltpu

HIDDEN = 128  # fixed by the PyTorch module (nn.Linear(input, 128))


def _round_up(v: int, m: int) -> int:
    return ((v + m - 1) // m) * m


def _cdiv(a: int, b: int) -> int:
    return (a + b - 1) // b


def _mlp_kernel(x_ref, w1_ref, b1_ref, w2_ref, b2_ref, o_ref):
    # layer1: x (tb, K) . W1 (H, K) contracting K -> (tb, H); f32 accumulation on the MXU.
    h = lax.dot_general(
        x_ref[...], w1_ref[...],
        dimension_numbers=(((1,), (1,)), ((), ())),
        preferred_element_type=jnp.float32,
    )
    h = jnp.maximum(h + b1_ref[...], 0.0)  # f32 bias + ReLU epilogue (VPU), stays in VMEM
    # layer2: h (tb, H) . W2 (out, H) contracting H -> (tb, out).  out_dim may be < 128
    # lanes; the full-dim output block avoids any padded writeback.
    o = lax.dot_general(
        h.astype(w2_ref.dtype), w2_ref[...],
        dimension_numbers=(((1,), (1,)), ((), ())),
        preferred_element_type=jnp.float32,
    )
    o_ref[...] = (o + b2_ref[...]).astype(o_ref.dtype)


def prepare_params(w1, b1, w2, b2, compute_dtype=jnp.float32):
    """One-time parameter prep (outside the hot path).

    PyTorch nn.Linear layout: w1 (128, in), b1 (128,), w2 (out, 128), b2 (out,).
    Weights are cast to compute_dtype (f32 or bf16); biases stay f32 (epilogue is f32).
    No output-dim padding — the kernel stores the true (tb, out_dim) block.
    """
    h = w1.shape[0]
    out_dim = w2.shape[0]
    w1_p = w1.astype(compute_dtype)
    b1_p = b1.reshape(1, h).astype(jnp.float32)
    w2_p = w2.astype(compute_dtype)
    b2_p = b2.reshape(1, out_dim).astype(jnp.float32)
    return w1_p, b1_p, w2_p, b2_p


@jax.jit
def mlp_forward(x, w1, b1_2d, w2, b2_2d):
    """x: (B, in). Params from prepare_params. Returns logits (B, out_dim) in compute dtype."""
    B, in_dim = x.shape
    out_dim = w2.shape[0]
    compute_dtype = w1.dtype
    out_dtype = compute_dtype  # bf16 path also stores bf16 logits (halves output writeback)

    # Sublane granule: bf16 packs 16 rows per vreg sublane group, f32 packs 8.
    sub = 16 if compute_dtype == jnp.bfloat16 else 8

    # Batch tile: large (amortizes ~0.35us/step grid overhead), capped at 1024 rows,
    # and sized so B splits into >=2 grid steps when possible (v7x: 2 TensorCores).
    if B <= sub:
        tb = B  # full-dim block (legal: block dim equal to full array dim)
    else:
        tb = min(1024, max(sub, _round_up(_cdiv(B, 2), sub)))
    grid = (_cdiv(B, tb),)

    x_c = x.astype(compute_dtype)

    # Explicit VMEM budget: double-buffered x/out tiles + (conservatively x2) resident
    # weights/biases + headroom.  Clamped to 32 MiB (v7x scoped default).
    isz = jnp.dtype(compute_dtype).itemsize
    osz = jnp.dtype(out_dtype).itemsize
    vmem_bytes = (
        2 * tb * in_dim * isz
        + 2 * tb * out_dim * osz
        + 2 * (HIDDEN * in_dim + out_dim * HIDDEN) * isz
        + 2 * (HIDDEN + out_dim) * 4
    )
    vmem_limit = min(max(vmem_bytes + (2 << 20), 4 << 20), 32 << 20)

    out = pl.pallas_call(
        _mlp_kernel,
        out_shape=jax.ShapeDtypeStruct((B, out_dim), out_dtype),
        grid=grid,
        in_specs=[
            pl.BlockSpec((tb, in_dim), lambda i: (i, 0)),        # x: tiled over batch
            pl.BlockSpec((HIDDEN, in_dim), lambda i: (0, 0)),    # w1: VMEM-resident
            pl.BlockSpec((1, HIDDEN), lambda i: (0, 0)),         # b1: resident
            pl.BlockSpec((out_dim, HIDDEN), lambda i: (0, 0)),   # w2: resident (native layout)
            pl.BlockSpec((1, out_dim), lambda i: (0, 0)),        # b2: resident
        ],
        out_specs=pl.BlockSpec((tb, out_dim), lambda i: (i, 0)),
        compiler_params=pltpu.CompilerParams(
            dimension_semantics=("parallel",),  # v7x: both TensorCores split the batch axis
            vmem_limit_bytes=int(vmem_limit),
        ),
    )(x_c, w1, b1_2d, w2, b2_2d)

    return out


def reference_forward(x, w1, b1, w2, b2):
    h = jnp.maximum(x @ w1.T + b1, 0.0)
    return h @ w2.T + b2


if __name__ == "__main__":
    # Shapes consistent with my_model(input=64, output=10); small batch.
    B, IN_DIM, OUT_DIM = 8, 64, 10

    key = jax.random.PRNGKey(0)
    kx, k1, k2, k3, k4 = jax.random.split(key, 5)

    x = jax.random.normal(kx, (B, IN_DIM), dtype=jnp.float32)
    # PyTorch Linear layout: W (out, in), b (out,)
    w1 = jax.random.normal(k1, (HIDDEN, IN_DIM), dtype=jnp.float32) * 0.05
    b1 = jax.random.normal(k2, (HIDDEN,), dtype=jnp.float32) * 0.05
    w2 = jax.random.normal(k3, (OUT_DIM, HIDDEN), dtype=jnp.float32) * 0.05
    b2 = jax.random.normal(k4, (OUT_DIM,), dtype=jnp.float32) * 0.05

    ref = reference_forward(x, w1, b1, w2, b2)

    # f32 path: exact-tolerance check against the PyTorch-equivalent reference.
    p_f32 = prepare_params(w1, b1, w2, b2, compute_dtype=jnp.float32)
    out_f32 = jax.block_until_ready(mlp_forward(x, *p_f32))
    assert out_f32.shape == (B, OUT_DIM)
    assert jnp.allclose(out_f32, ref, atol=1e-4, rtol=1e-4), "f32 mismatch vs reference"

    # bf16 path (the one to use on v6e/v7x/v5e): bf16 weights/x/logits, f32 accumulation.
    # Expected to diverge from the f32 reference at the bf16 rounding level.
    p_bf16 = prepare_params(w1, b1, w2, b2, compute_dtype=jnp.bfloat16)
    out_bf16 = jax.block_until_ready(mlp_forward(x, *p_bf16))
    assert out_bf16.shape == (B, OUT_DIM)
    assert jnp.allclose(out_bf16.astype(jnp.float32), ref, atol=5e-2, rtol=5e-2), \
        "bf16 mismatch vs reference"

    print("KERNEL_OK")
</pallas_src>

<mosaic_0001>
module attributes {stable_mosaic.version = 11 : i64} {
  func.func @_mlp_kernel(%arg0: i32, %arg1: memref<8x64xf32, #tpu.memory_space<vmem>>, %arg2: memref<128x64xf32, #tpu.memory_space<vmem>>, %arg3: memref<1x128xf32, #tpu.memory_space<vmem>>, %arg4: memref<10x128xf32, #tpu.memory_space<vmem>>, %arg5: memref<1x10xf32, #tpu.memory_space<vmem>>, %arg6: memref<8x10xf32, #tpu.memory_space<vmem>>) attributes {dimension_semantics = [#tpu.dimension_semantics<parallel>], iteration_bounds = array<i64: 1>, scalar_prefetch = 0 : i64, scratch_operands = 0 : i64, tpu.core_type = #tpu.core_type<tc>, window_params = [{transform_indices = @transform_0, window_bounds = array<i64: 8, 64>}, {pipeline_mode = #tpu.pipeline_mode<synchronous>, transform_indices = @transform_1, window_bounds = array<i64: 128, 64>}, {pipeline_mode = #tpu.pipeline_mode<synchronous>, transform_indices = @transform_2, window_bounds = array<i64: 1, 128>}, {pipeline_mode = #tpu.pipeline_mode<synchronous>, transform_indices = @transform_3, window_bounds = array<i64: 10, 128>}, {pipeline_mode = #tpu.pipeline_mode<synchronous>, transform_indices = @transform_4, window_bounds = array<i64: 1, 10>}, {transform_indices = @transform_5, window_bounds = array<i64: 8, 10>}]} {
    %c0 = arith.constant 0 : index
    %c0_0 = arith.constant 0 : index
    %0 = vector.load %arg1[%c0, %c0_0] : memref<8x64xf32, #tpu.memory_space<vmem>>, vector<8x64xf32>
    %c0_1 = arith.constant 0 : index
    %c0_2 = arith.constant 0 : index
    %1 = vector.load %arg2[%c0_1, %c0_2] : memref<128x64xf32, #tpu.memory_space<vmem>>, vector<128x64xf32>
    %cst = arith.constant dense<0.000000e+00> : vector<8x128xf32>
    %2 = tpu.matmul %0, %1, %cst {dimension_numbers = #tpu.dot_dimension_numbers<[1], [1], [0], [0], [0, 0, 1, 0], [], []>} : vector<8x64xf32>, vector<128x64xf32>, vector<8x128xf32> -> vector<8x128xf32>
    %c0_3 = arith.constant 0 : index
    %c0_4 = arith.constant 0 : index
    %3 = vector.load %arg3[%c0_3, %c0_4] : memref<1x128xf32, #tpu.memory_space<vmem>>, vector<1x128xf32>
    %4 = vector.broadcast %3 : vector<1x128xf32> to vector<8x128xf32>
    %5 = arith.addf %2, %4 : vector<8x128xf32>
    %cst_5 = arith.constant 0.000000e+00 : f32
    %6 = vector.broadcast %cst_5 : f32 to vector<8x128xf32>
    %7 = arith.maximumf %5, %6 : vector<8x128xf32>
    %c0_6 = arith.constant 0 : index
    %c0_7 = arith.constant 0 : index
    %8 = vector.load %arg4[%c0_6, %c0_7] : memref<10x128xf32, #tpu.memory_space<vmem>>, vector<10x128xf32>
    %cst_8 = arith.constant dense<0.000000e+00> : vector<8x10xf32>
    %9 = tpu.matmul %7, %8, %cst_8 {dimension_numbers = #tpu.dot_dimension_numbers<[1], [1], [0], [0], [0, 0, 1, 0], [], []>} : vector<8x128xf32>, vector<10x128xf32>, vector<8x10xf32> -> vector<8x10xf32>
    %c0_9 = arith.constant 0 : index
    %c0_10 = arith.constant 0 : index
    %10 = vector.load %arg5[%c0_9, %c0_10] : memref<1x10xf32, #tpu.memory_space<vmem>>, vector<1x10xf32>
    %11 = vector.broadcast %10 : vector<1x10xf32> to vector<8x10xf32>
    %12 = arith.addf %9, %11 : vector<8x10xf32>
    %c0_11 = arith.constant 0 : index
    %c0_12 = arith.constant 0 : index
    %13 = vector.load %arg6[%c0_11, %c0_12] : memref<8x10xf32, #tpu.memory_space<vmem>>, vector<8x10xf32>
    tpu.vector_store %arg6[%c0_11, %c0_12], %12 {strides = array<i32>} : memref<8x10xf32, #tpu.memory_space<vmem>>, vector<8x10xf32>,
    return
  }
  func.func @transform_0(%arg0: i32) -> (i32, i32) {
    %c0_i32 = arith.constant 0 : i32
    %c0_i32_0 = arith.constant 0 : i32
    return %arg0, %c0_i32 : i32, i32
  }
  func.func @transform_1(%arg0: i32) -> (i32, i32) {
    %c0_i32 = arith.constant 0 : i32
    %c0_i32_0 = arith.constant 0 : i32
    %c0_i32_1 = arith.constant 0 : i32
    return %c0_i32, %c0_i32_0 : i32, i32
  }
  func.func @transform_2(%arg0: i32) -> (i32, i32) {
    %c0_i32 = arith.constant 0 : i32
    %c0_i32_0 = arith.constant 0 : i32
    %c0_i32_1 = arith.constant 0 : i32
    return %c0_i32, %c0_i32_0 : i32, i32
  }
  func.func @transform_3(%arg0: i32) -> (i32, i32) {
    %c0_i32 = arith.constant 0 : i32
    %c0_i32_0 = arith.constant 0 : i32
    %c0_i32_1 = arith.constant 0 : i32
    return %c0_i32, %c0_i32_0 : i32, i32
  }
  func.func @transform_4(%arg0: i32) -> (i32, i32) {
    %c0_i32 = arith.constant 0 : i32
    %c0_i32_0 = arith.constant 0 : i32
    %c0_i32_1 = arith.constant 0 : i32
    return %c0_i32, %c0_i32_0 : i32, i32
  }
  func.func @transform_5(%arg0: i32) -> (i32, i32) {
    %c0_i32 = arith.constant 0 : i32
    %c0_i32_0 = arith.constant 0 : i32
    return %arg0, %c0_i32 : i32, i32
  }
}

</mosaic_0001>

<bundles_post_ra>
// kernel: mlp_forward.1
= control target key start
LH: loop header
LB: loop body
LE: loop exit
PB: predicated region body
PF: predicated region fallthrough
CT: control target
= control target key end

     0   :  { %vm42_vm0 = vcmask 523264   ;;  %s319_s0 = inlined_call_operand.vmem [shape: f32[8,64], index: 0, kind: input, shape index: {}]   ;;  %s320_s1 = inlined_call_operand.vmem [shape: f32[128,64], index: 1, kind: input, shape index: {}]   ;;  %s321_s2 = inlined_call_operand.vmem [shape: f32[1,128], index: 2, kind: input, shape index: {}]   ;;  %s322_s3 = inlined_call_operand.vmem [shape: f32[10,128], index: 3, kind: input, shape index: {}]   ;;  %s323_s4 = inlined_call_operand.vmem [shape: f32[1,10], index: 4, kind: input, shape index: {}]   ;;  %s324_s5 = inlined_call_operand.hbm [shape: f32[8,10], index: 5, kind: output, shape index: {}]  }
   0x1   :  { %v37_v0 = vld [vmem:[%s320_s1 + $0x78] sm:$0xff]  ;;  %v36_v1 = vld [vmem:[%s320_s1 + $0x70] sm:$0xff] }
   0x2   :  { %159 = vmatpush.xpose.msk.msra.mxu0 %vm42_vm0, %v37_v0 }
   0x3   :  { %10 = vsyncpa [#allocation3], 0  ;;  %v35_v2 = vld [vmem:[%s320_s1 + $0x68] sm:$0xff]  ;;  %v34_v3 = vld [vmem:[%s320_s1 + $0x60] sm:$0xff]  ;;  %s150_s12 = sshll.u32 %s324_s5, 4  ;;  %vm141_vm1 = vcmask 80896   ;;  %s151_s12 = int_to_ptr.hbm [resolvable:$true] %s150_s12 }
   0x4   :  { %v33_v4 = vld [vmem:[%s320_s1 + $0x58] sm:$0xff]  ;;  %v32_v5 = vld [vmem:[%s320_s1 + $0x50] sm:$0xff]  ;;  %v31_v6 = vld [vmem:[%s320_s1 + $0x48] sm:$0xff] }
   0x5   :  { %v30_v7 = vld [vmem:[%s320_s1 + $0x40] sm:$0xff]  ;;  %v29_v8 = vld [vmem:[%s320_s1 + $0x38] sm:$0xff]  ;;  %v116_v9 = vld [vmem:[%s322_s3 + $0x8] sm:$0x3] }
   0x6   :  { %160 = vmatpush.xpose.msk.msra.mxu0 %vm42_vm0, %v36_v1  ;;  %135 = vmatpush.xpose.msra.mxu1 %v116_v9  ;;  %v28_v10 = vld [vmem:[%s320_s1 + $0x30] sm:$0xff]  ;;  %v27_v11 = vld [vmem:[%s320_s1 + $0x28] sm:$0xff]  ;;  %v26_v12 = vld [vmem:[%s320_s1 + $0x20] sm:$0xff] }
   0x7   :  { %v25_v13 = vld [vmem:[%s320_s1 + $0x18] sm:$0xff]  ;;  %v24_v14 = vld [vmem:[%s320_s1 + $0x10] sm:$0xff]  ;;  %v23_v15 = vld [vmem:[%s320_s1 + $0x8] sm:$0xff] }
   0x8   :  { %v22_v16 = vld [vmem:[%s320_s1] sm:$0xff] }
   0x9   :  { %v21_v17 = vld [vmem:[%s319_s0] sm:$0xff]  ;;  %s205_s0 = smov [#allocation2]  }
   0xa   :  { %161 = vmatpush.xpose.msk.msra.mxu0 %vm42_vm0, %v35_v2  ;;  %v115_v18 = vld [vmem:[%s322_s3] sm:$0xff]  ;;  %s148_s9 = sshll.u32 %s205_s0, 4  ;;  %s149_s9 = int_to_ptr.vmem [resolvable:$true] %s148_s9 }
   0xb   :  { %136 = vmatpush.xpose.msra.mxu1 %v115_v18  ;;  %v177_v19 = vld [vmem:[%s321_s2] ss:$0 sm:$0xff] }
   0xc   :  { %v178_v23 = vld [vmem:[%s323_s4] ss:$0 sm:$0xff] }
   0xe   :  { %162 = vmatpush.xpose.msk.msra.mxu0 %vm42_vm0, %v34_v3 }
  0x12   :  { %163 = vmatpush.xpose.msk.msra.mxu0 %vm42_vm0, %v33_v4 }
  0x16   :  { %164 = vmatpush.xpose.msk.msra.mxu0 %vm42_vm0, %v32_v5 }
  0x1a   :  { %165 = vmatpush.xpose.msk.msra.mxu0 %vm42_vm0, %v31_v6 }
  0x1e   :  { %166 = vmatpush.xpose.msk.msra.mxu0 %vm42_vm0, %v30_v7 }
  0x22   :  { %167 = vmatpush.xpose.msk.msra.mxu0 %vm42_vm0, %v29_v8 }
  0x26   :  { %168 = vmatpush.xpose.msk.msra.mxu0 %vm42_vm0, %v28_v10 }
  0x2a   :  { %169 = vmatpush.xpose.msk.msra.mxu0 %vm42_vm0, %v27_v11 }
  0x2e   :  { %170 = vmatpush.xpose.msk.msra.mxu0 %vm42_vm0, %v26_v12 }
  0x32   :  { %171 = vmatpush.xpose.msk.msra.mxu0 %vm42_vm0, %v25_v13 }
  0x36   :  { %172 = vmatpush.xpose.msk.msra.mxu0 %vm42_vm0, %v24_v14 }
  0x3a   :  { %173 = vmatpush.xpose.msk.msra.mxu0 %vm42_vm0, %v23_v15 }
  0x3e   :  { %174 = vmatpush.xpose.msk.msra.mxu0 %vm42_vm0, %v22_v16 }
  0x41   :  { %175 = vmatmul.msk.f32.vlgmr.msra.gmra.mxu0 %vm42_vm0, %v21_v17 }
  0xbe   :  { %v111_v20 = vpop.f32.mrf.mxu0 }
  0xbf   :  { %v112_v21 = vadd.f32 %v177_v19, %v111_v20 }
  0xc1   :  { %v114_v22 = vmax.f32 %v112_v21, 0.0 }
  0xc3   :  { %137 = vmatmul.f32.vlgmr.msra.gmra.mxu1 %v114_v22 }
 0x140   :  { %v138_v24 = vpop.f32.mrf.mxu1 }
 0x141   :  { %v139_v25 = vadd.f32 %v178_v23, %v138_v24 }
 0x143   :  { %142 = vst.msk [vmem:[#allocation2] sm:$0xff] %vm141_vm1, %v139_v25 }
 0x144   :  { %153 = dma.vmem_to_hbm [thread:$0]  %s149_s9, 128, %s151_s12, [#allocation3]  }
 0x145   :  { %203 = dma.done.wait [#allocation3], 128  }
 0x146   :  { %204 = vsyncadd [#allocation3], 4294967168 }
 0x147   :  { %158 = vsyncpa [#allocation3], 1 }

</bundles_post_ra>
